<compile_context>
chip_gen: v5e
topology: v5e:2x2
jax: 0.10.0
libtpu: 0.0.40
codegen_flags: <defaults>
</compile_context>

<pallas_src>
import jax
import jax.numpy as jnp
from jax.experimental import pallas as pl
from jax.experimental.pallas import tpu as pltpu

LN_EPS = 1e-5

_ACT_VMEM_BUDGET = 24 * 2**20   # double-buffered activation tiles + params must fit this
_VMEM_LIMIT_CAP = 56 * 2**20    # stay under v7x's 64 MiB physical VMEM


def _round_up(n, m):
    return ((n + m - 1) // m) * m


def _vmem_block_bytes(shape, dtype):
    """Lane/sublane-padded VMEM footprint of one pipelined block."""
    itemsize = jnp.dtype(dtype).itemsize
    sublane = 8 * max(1, 4 // itemsize)            # 8 rows for f32, 16 for bf16
    dims = (1,) * max(0, 2 - len(shape)) + tuple(int(d) for d in shape)
    lead = 1
    for d in dims[:-2]:
        lead *= d
    return lead * _round_up(dims[-2], sublane) * _round_up(dims[-1], 128) * itemsize


def add_navi_latent_kernel(x_ref, z_ref, v_ref, w_in_ref, w_stk_ref,
                           vec_ref, avg_ref, exp_ref, o_ref):
    """Fused AddNaviLatent on `pack` tokens per 128-lane row (block-diagonal weights)."""
    avg = avg_ref[...]                                  # [P*H, P*H] block-averaging matrix

    def layer(h, w, idx):
        b = vec_ref[3 * idx + 0:3 * idx + 1, :]
        g = vec_ref[3 * idx + 1:3 * idx + 2, :]
        be = vec_ref[3 * idx + 2:3 * idx + 3, :]
        acc = jnp.dot(h.astype(w.dtype), w, preferred_element_type=jnp.float32) + b
        # Per-token (H-lane-block) LayerNorm stats on the MXU; two-pass variance.
        mu = jnp.dot(acc, avg, preferred_element_type=jnp.float32)
        c = acc - mu
        var = jnp.dot(c * c, avg, preferred_element_type=jnp.float32)
        hn = c * jax.lax.rsqrt(var + LN_EPS)
        return jnp.maximum(hn * g + be, 0.0)            # ReLU (dropout_p=0 -> no-op)

    x = x_ref[...].astype(jnp.float32)                  # [T, P*H]
    v = v_ref[...].astype(jnp.float32)                  # [T, P]
    if v.shape[-1] == 1:                                # pack == 1 fallback
        valid = v
    else:                                               # expand per-token mask to its lane block
        valid = jnp.dot(v, exp_ref[...], preferred_element_type=jnp.float32)
    invalid = 1.0 - valid

    # z = mlp_in(z)
    zz = layer(z_ref[...].astype(jnp.float32), w_in_ref[...], 0)
    zz = layer(zz, w_stk_ref[0], 1)
    # mode='add': h = x + z.masked_fill(z_invalid, 0)
    h = x + zz * valid
    # h = mlp(h, z_invalid)   (mask applied to the MLP output)
    h = layer(h, w_stk_ref[1], 2)
    h = layer(h, w_stk_ref[2], 3)
    # res_add=False: out = h.masked_fill(z_invalid, 0) + x.masked_fill(z_valid, 0)
    o_ref[...] = (h * valid + x * invalid).astype(o_ref.dtype)


def _pack_params(params, pack, matmul_dtype):
    """Block-diagonal / block-tiled parameter slabs for the packed-token kernel."""
    eye = jnp.eye(pack, dtype=jnp.float32)
    bd = lambda w: jnp.kron(eye, w.astype(jnp.float32))
    w_in = bd(params["w1"]).astype(matmul_dtype)                          # [P*in, P*H]
    w_stk = jnp.stack([bd(params["w2"]), bd(params["w3"]),
                       bd(params["w4"])]).astype(matmul_dtype)            # [3, P*H, P*H]
    vec = jnp.concatenate(
        [jnp.tile(params[k].reshape(1, -1).astype(jnp.float32), (1, pack))
         for k in ("b1", "g1", "be1", "b2", "g2", "be2",
                   "b3", "g3", "be3", "b4", "g4", "be4")], axis=0)        # [12, P*H]
    hidden = params["w2"].shape[0]
    avg = jnp.kron(eye, jnp.full((hidden, hidden), 1.0 / hidden, jnp.float32))  # [P*H, P*H]
    exp_mat = jnp.kron(eye, jnp.ones((1, hidden), jnp.float32))                 # [P, P*H]
    return w_in, w_stk, vec, avg, exp_mat


def add_navi_latent(x, z, z_valid, params, *, row_tile=2048, matmul_dtype=jnp.bfloat16):
    """x: [n_sc, n_ag, H], z: [n_sc, n_ag, in_dim], z_valid: [n_sc, n_ag] bool. Jittable."""
    n_sc, n_ag, hidden_dim = x.shape
    in_dim = z.shape[-1]
    n_tok = n_sc * n_ag

    # Pack `pack` tokens per 128-lane row so vld/vst are lane-dense and MXU K/N are 128.
    pack = 128 // hidden_dim if (hidden_dim <= 128 and 128 % hidden_dim == 0) else 1

    x2 = x.reshape(n_tok, hidden_dim)
    z2 = z.reshape(n_tok, in_dim)
    v2 = z_valid.reshape(n_tok).astype(jnp.float32)

    pad_tok = (-n_tok) % pack
    if pad_tok:
        # TODO(synk): only hit when n_sc*n_ag isn't a multiple of the packing factor;
        # <pack padded tokens (valid=0), sliced off below.
        x2 = jnp.pad(x2, ((0, pad_tok), (0, 0)))
        z2 = jnp.pad(z2, ((0, pad_tok), (0, 0)))
        v2 = jnp.pad(v2, ((0, pad_tok),))
    rows = (n_tok + pad_tok) // pack

    xp = x2.reshape(rows, pack * hidden_dim)     # contiguous reshapes: free under jit
    zp = z2.reshape(rows, pack * in_dim)
    vp = v2.reshape(rows, pack)

    w_in, w_stk, vec, avg, exp_mat = _pack_params(params, pack, matmul_dtype)
    flat_params = (w_in, w_stk, vec, avg, exp_mat)
    param_bytes = sum(_vmem_block_bytes(p.shape, p.dtype) for p in flat_params)

    # Per-row VMEM bytes of the pipelined activation streams (lane-padded to 128).
    stream_widths = (pack * hidden_dim, pack * in_dim, pack, pack * hidden_dim)  # x, z, v, out
    row_bytes = sum(4 * _round_up(max(w, 1), 128) for w in stream_widths)

    # Largest multiple-of-8 row tile that keeps double-buffered streams + params in budget.
    tile = max(8, min((int(row_tile) // 8) * 8, _round_up(rows, 8)))
    while tile > 8 and 2 * tile * row_bytes + 2 * param_bytes > _ACT_VMEM_BUDGET:
        tile = max(8, _round_up(tile // 2, 8))
    if tile >= rows:
        tile = rows          # single block = full axis (always a legal block shape)

    grid = (pl.cdiv(rows, tile),)   # no wrapper padding: Pallas read-pads/write-masks the tail

    vmem_limit = int(min(_VMEM_LIMIT_CAP,
                         max(32 * 2**20,
                             2 * tile * row_bytes + 2 * param_bytes + (4 << 20))))

    tok_spec = lambda w: pl.BlockSpec((tile, w), lambda i: (i, 0))
    const2 = lambda s: pl.BlockSpec(s, lambda i: (0, 0))
    const3 = lambda s: pl.BlockSpec(s, lambda i: (0, 0, 0))

    out = pl.pallas_call(
        add_navi_latent_kernel,
        out_shape=jax.ShapeDtypeStruct((rows, pack * hidden_dim), x.dtype),
        grid=grid,
        in_specs=[
            tok_spec(pack * hidden_dim),   # x
            tok_spec(pack * in_dim),       # z
            tok_spec(pack),                # valid mask (pack lanes/row; no concat copy)
            const2(w_in.shape),
            const3(w_stk.shape),
            const2(vec.shape),
            const2(avg.shape),
            const2(exp_mat.shape),
        ],
        out_specs=tok_spec(pack * hidden_dim),
        compiler_params=pltpu.CompilerParams(
            dimension_semantics=("parallel",),   # shard token grid across v7x's 2 TCs
            vmem_limit_bytes=vmem_limit),
    )(xp, zp, vp, *flat_params)

    out = out.reshape(rows * pack, hidden_dim)
    if pad_tok:
        out = out[:n_tok]
    return out.reshape(n_sc, n_ag, hidden_dim)


def init_params(key, hidden_dim, in_dim):
    """Deterministic synthetic parameters (matches MLP([in]+[H]*2) twice)."""
    ks = jax.random.split(key, 4)

    def linear(k, d_in, d_out):
        w = jax.random.normal(k, (d_out, d_in), jnp.float32) * 0.1  # torch layout [out,in]
        b = jnp.linspace(-0.1, 0.1, d_out, dtype=jnp.float32)
        return w.T, b.reshape(1, d_out)  # pre-transpose to [in,out] for the kernel

    def ln(d):
        return jnp.ones((1, d), jnp.float32), jnp.zeros((1, d), jnp.float32)

    w1, b1 = linear(ks[0], in_dim, hidden_dim)
    w2, b2 = linear(ks[1], hidden_dim, hidden_dim)
    w3, b3 = linear(ks[2], hidden_dim, hidden_dim)
    w4, b4 = linear(ks[3], hidden_dim, hidden_dim)
    g1, be1 = ln(hidden_dim); g2, be2 = ln(hidden_dim)
    g3, be3 = ln(hidden_dim); g4, be4 = ln(hidden_dim)
    return dict(w1=w1, b1=b1, g1=g1, be1=be1, w2=w2, b2=b2, g2=g2, be2=be2,
                w3=w3, b3=b3, g3=g3, be3=be3, w4=w4, b4=b4, g4=g4, be4=be4)


def _reference(x, z, z_valid, p):
    """Pure-JAX reference mirroring the PyTorch forward (mode='add', res_add=False)."""
    def lin_ln_relu(h, w, b, g, be):
        h = h @ w + b
        mu = jnp.mean(h, -1, keepdims=True)
        var = jnp.mean((h - mu) ** 2, -1, keepdims=True)
        h = (h - mu) / jnp.sqrt(var + LN_EPS) * g + be
        return jnp.maximum(h, 0.0)

    valid = z_valid[..., None].astype(jnp.float32)
    zz = lin_ln_relu(z, p["w1"], p["b1"], p["g1"], p["be1"])
    zz = lin_ln_relu(zz, p["w2"], p["b2"], p["g2"], p["be2"])
    h = x + zz * valid
    h = lin_ln_relu(h, p["w3"], p["b3"], p["g3"], p["be3"])
    h = lin_ln_relu(h, p["w4"], p["b4"], p["g4"], p["be4"])
    h = h * valid
    return h + x * (1.0 - valid)


if __name__ == "__main__":
    n_sc, n_ag, hidden_dim, in_dim = 2, 8, 32, 16

    key = jax.random.PRNGKey(0)
    kx, kz, kv, kp = jax.random.split(key, 4)
    x = jax.random.normal(kx, (n_sc, n_ag, hidden_dim), jnp.float32)
    z = jax.random.normal(kz, (n_sc, n_ag, in_dim), jnp.float32)
    z_valid = jax.random.bernoulli(kv, 0.7, (n_sc, n_ag))

    params = init_params(kp, hidden_dim, in_dim)
    ref = _reference(x, z, z_valid, params)

    # Production path: bf16 MXU operands, f32 accumulation + f32 LN/elementwise.
    run_bf16 = jax.jit(lambda a, b, c: add_navi_latent(a, b, c, params))
    out_bf16 = jax.block_until_ready(run_bf16(x, z, z_valid))
    assert out_bf16.shape == (n_sc, n_ag, hidden_dim)
    assert jnp.allclose(out_bf16, ref, atol=6e-2, rtol=6e-2), "bf16-path mismatch"

    # Full-f32 path: tight check against the reference.
    run_f32 = jax.jit(lambda a, b, c: add_navi_latent(a, b, c, params,
                                                      matmul_dtype=jnp.float32))
    out_f32 = jax.block_until_ready(run_f32(x, z, z_valid))
    assert jnp.allclose(out_f32, ref, atol=2e-4, rtol=2e-4), "f32-path mismatch"

    print("KERNEL_OK")
</pallas_src>

<mosaic_0001>
module attributes {stable_mosaic.version = 11 : i64} {
  func.func @add_navi_latent_kernel(%arg0: i32, %arg1: memref<4x128xf32, #tpu.memory_space<vmem>>, %arg2: memref<4x64xf32, #tpu.memory_space<vmem>>, %arg3: memref<4x4xf32, #tpu.memory_space<vmem>>, %arg4: memref<64x128xbf16, #tpu.memory_space<vmem>>, %arg5: memref<3x128x128xbf16, #tpu.memory_space<vmem>>, %arg6: memref<12x128xf32, #tpu.memory_space<vmem>>, %arg7: memref<128x128xf32, #tpu.memory_space<vmem>>, %arg8: memref<4x128xf32, #tpu.memory_space<vmem>>, %arg9: memref<4x128xf32, #tpu.memory_space<vmem>>) attributes {dimension_semantics = [#tpu.dimension_semantics<parallel>], iteration_bounds = array<i64: 1>, scalar_prefetch = 0 : i64, scratch_operands = 0 : i64, tpu.core_type = #tpu.core_type<tc>, window_params = [{transform_indices = @transform_0, window_bounds = array<i64: 4, 128>}, {transform_indices = @transform_1, window_bounds = array<i64: 4, 64>}, {transform_indices = @transform_2, window_bounds = array<i64: 4, 4>}, {pipeline_mode = #tpu.pipeline_mode<synchronous>, transform_indices = @transform_3, window_bounds = array<i64: 64, 128>}, {pipeline_mode = #tpu.pipeline_mode<synchronous>, transform_indices = @transform_4, window_bounds = array<i64: 3, 128, 128>}, {pipeline_mode = #tpu.pipeline_mode<synchronous>, transform_indices = @transform_5, window_bounds = array<i64: 12, 128>}, {pipeline_mode = #tpu.pipeline_mode<synchronous>, transform_indices = @transform_6, window_bounds = array<i64: 128, 128>}, {pipeline_mode = #tpu.pipeline_mode<synchronous>, transform_indices = @transform_7, window_bounds = array<i64: 4, 128>}, {transform_indices = @transform_8, window_bounds = array<i64: 4, 128>}]} {
    %c0 = arith.constant 0 : index
    %c0_0 = arith.constant 0 : index
    %0 = vector.load %arg7[%c0, %c0_0] : memref<128x128xf32, #tpu.memory_space<vmem>>, vector<128x128xf32>
    %c0_1 = arith.constant 0 : index
    %c0_2 = arith.constant 0 : index
    %1 = vector.load %arg1[%c0_1, %c0_2] : memref<4x128xf32, #tpu.memory_space<vmem>>, vector<4x128xf32>
    %c0_3 = arith.constant 0 : index
    %c0_4 = arith.constant 0 : index
    %2 = vector.load %arg3[%c0_3, %c0_4] : memref<4x4xf32, #tpu.memory_space<vmem>>, vector<4x4xf32>
    %c0_5 = arith.constant 0 : index
    %c0_6 = arith.constant 0 : index
    %3 = vector.load %arg8[%c0_5, %c0_6] : memref<4x128xf32, #tpu.memory_space<vmem>>, vector<4x128xf32>
    %cst = arith.constant dense<0.000000e+00> : vector<4x128xf32>
    %4 = tpu.matmul %2, %3, %cst {dimension_numbers = #tpu.dot_dimension_numbers<[1], [0], [0], [1], [0, 0, 1, 1], [], []>} : vector<4x4xf32>, vector<4x128xf32>, vector<4x128xf32> -> vector<4x128xf32>
    %cst_7 = arith.constant 1.000000e+00 : f32
    %5 = vector.broadcast %cst_7 : f32 to vector<4x128xf32>
    %6 = arith.subf %5, %4 : vector<4x128xf32>
    %c0_8 = arith.constant 0 : index
    %c0_9 = arith.constant 0 : index
    %7 = vector.load %arg2[%c0_8, %c0_9] : memref<4x64xf32, #tpu.memory_space<vmem>>, vector<4x64xf32>
    %c0_10 = arith.constant 0 : index
    %c0_11 = arith.constant 0 : index
    %8 = vector.load %arg4[%c0_10, %c0_11] : memref<64x128xbf16, #tpu.memory_space<vmem>>, vector<64x128xbf16>
    %c0_12 = arith.constant 0 : index
    %c0_13 = arith.constant 0 : index
    %9 = vector.load %arg6[%c0_12, %c0_13] : memref<12x128xf32, #tpu.memory_space<vmem>>, vector<1x128xf32>
    %c1 = arith.constant 1 : index
    %c0_14 = arith.constant 0 : index
    %10 = vector.load %arg6[%c1, %c0_14] : memref<12x128xf32, #tpu.memory_space<vmem>>, vector<1x128xf32>
    %c2 = arith.constant 2 : index
    %c0_15 = arith.constant 0 : index
    %11 = vector.load %arg6[%c2, %c0_15] : memref<12x128xf32, #tpu.memory_space<vmem>>, vector<1x128xf32>
    %12 = arith.truncf %7 : vector<4x64xf32> to vector<4x64xbf16>
    %cst_16 = arith.constant dense<0.000000e+00> : vector<4x128xf32>
    %13 = tpu.matmul %12, %8, %cst_16 {dimension_numbers = #tpu.dot_dimension_numbers<[1], [0], [0], [1], [0, 0, 1, 1], [], []>} : vector<4x64xbf16>, vector<64x128xbf16>, vector<4x128xf32> -> vector<4x128xf32>
    %14 = vector.broadcast %9 : vector<1x128xf32> to vector<4x128xf32>
    %15 = arith.addf %13, %14 : vector<4x128xf32>
    %cst_17 = arith.constant dense<0.000000e+00> : vector<4x128xf32>
    %16 = tpu.matmul %15, %0, %cst_17 {dimension_numbers = #tpu.dot_dimension_numbers<[1], [0], [0], [1], [0, 0, 1, 1], [], []>} : vector<4x128xf32>, vector<128x128xf32>, vector<4x128xf32> -> vector<4x128xf32>
    %17 = arith.subf %15, %16 : vector<4x128xf32>
    %18 = arith.mulf %17, %17 : vector<4x128xf32>
    %cst_18 = arith.constant dense<0.000000e+00> : vector<4x128xf32>
    %19 = tpu.matmul %18, %0, %cst_18 {dimension_numbers = #tpu.dot_dimension_numbers<[1], [0], [0], [1], [0, 0, 1, 1], [], []>} : vector<4x128xf32>, vector<128x128xf32>, vector<4x128xf32> -> vector<4x128xf32>
    %cst_19 = arith.constant 9.99999974E-6 : f32
    %20 = vector.broadcast %cst_19 : f32 to vector<4x128xf32>
    %21 = arith.addf %19, %20 : vector<4x128xf32>
    %22 = math.rsqrt %21 : vector<4x128xf32>
    %23 = arith.mulf %17, %22 : vector<4x128xf32>
    %24 = vector.broadcast %10 : vector<1x128xf32> to vector<4x128xf32>
    %25 = arith.mulf %23, %24 : vector<4x128xf32>
    %26 = vector.broadcast %11 : vector<1x128xf32> to vector<4x128xf32>
    %27 = arith.addf %25, %26 : vector<4x128xf32>
    %cst_20 = arith.constant 0.000000e+00 : f32
    %28 = vector.broadcast %cst_20 : f32 to vector<4x128xf32>
    %29 = arith.maximumf %27, %28 : vector<4x128xf32>
    %c0_21 = arith.constant 0 : index
    %c0_22 = arith.constant 0 : index
    %c0_23 = arith.constant 0 : index
    %30 = vector.load %arg5[%c0_21, %c0_22, %c0_23] : memref<3x128x128xbf16, #tpu.memory_space<vmem>>, vector<1x128x128xbf16>
    %31 = vector.shape_cast %30 : vector<1x128x128xbf16> to vector<128x128xbf16>
    %c3 = arith.constant 3 : index
    %c0_24 = arith.constant 0 : index
    %32 = vector.load %arg6[%c3, %c0_24] : memref<12x128xf32, #tpu.memory_space<vmem>>, vector<1x128xf32>
    %c4 = arith.constant 4 : index
    %c0_25 = arith.constant 0 : index
    %33 = vector.load %arg6[%c4, %c0_25] : memref<12x128xf32, #tpu.memory_space<vmem>>, vector<1x128xf32>
    %c5 = arith.constant 5 : index
    %c0_26 = arith.constant 0 : index
    %34 = vector.load %arg6[%c5, %c0_26] : memref<12x128xf32, #tpu.memory_space<vmem>>, vector<1x128xf32>
    %35 = arith.truncf %29 : vector<4x128xf32> to vector<4x128xbf16>
    %cst_27 = arith.constant dense<0.000000e+00> : vector<4x128xf32>
    %36 = tpu.matmul %35, %31, %cst_27 {dimension_numbers = #tpu.dot_dimension_numbers<[1], [0], [0], [1], [0, 0, 1, 1], [], []>} : vector<4x128xbf16>, vector<128x128xbf16>, vector<4x128xf32> -> vector<4x128xf32>
    %37 = vector.broadcast %32 : vector<1x128xf32> to vector<4x128xf32>
    %38 = arith.addf %36, %37 : vector<4x128xf32>
    %cst_28 = arith.constant dense<0.000000e+00> : vector<4x128xf32>
    %39 = tpu.matmul %38, %0, %cst_28 {dimension_numbers = #tpu.dot_dimension_numbers<[1], [0], [0], [1], [0, 0, 1, 1], [], []>} : vector<4x128xf32>, vector<128x128xf32>, vector<4x128xf32> -> vector<4x128xf32>
    %40 = arith.subf %38, %39 : vector<4x128xf32>
    %41 = arith.mulf %40, %40 : vector<4x128xf32>
    %cst_29 = arith.constant dense<0.000000e+00> : vector<4x128xf32>
    %42 = tpu.matmul %41, %0, %cst_29 {dimension_numbers = #tpu.dot_dimension_numbers<[1], [0], [0], [1], [0, 0, 1, 1], [], []>} : vector<4x128xf32>, vector<128x128xf32>, vector<4x128xf32> -> vector<4x128xf32>
    %cst_30 = arith.constant 9.99999974E-6 : f32
    %43 = vector.broadcast %cst_30 : f32 to vector<4x128xf32>
    %44 = arith.addf %42, %43 : vector<4x128xf32>
    %45 = math.rsqrt %44 : vector<4x128xf32>
    %46 = arith.mulf %40, %45 : vector<4x128xf32>
    %47 = vector.broadcast %33 : vector<1x128xf32> to vector<4x128xf32>
    %48 = arith.mulf %46, %47 : vector<4x128xf32>
    %49 = vector.broadcast %34 : vector<1x128xf32> to vector<4x128xf32>
    %50 = arith.addf %48, %49 : vector<4x128xf32>
    %cst_31 = arith.constant 0.000000e+00 : f32
    %51 = vector.broadcast %cst_31 : f32 to vector<4x128xf32>
    %52 = arith.maximumf %50, %51 : vector<4x128xf32>
    %53 = arith.mulf %52, %4 : vector<4x128xf32>
    %54 = arith.addf %1, %53 : vector<4x128xf32>
    %c1_32 = arith.constant 1 : index
    %c0_33 = arith.constant 0 : index
    %c0_34 = arith.constant 0 : index
    %55 = vector.load %arg5[%c1_32, %c0_33, %c0_34] : memref<3x128x128xbf16, #tpu.memory_space<vmem>>, vector<1x128x128xbf16>
    %56 = vector.shape_cast %55 : vector<1x128x128xbf16> to vector<128x128xbf16>
    %c6 = arith.constant 6 : index
    %c0_35 = arith.constant 0 : index
    %57 = vector.load %arg6[%c6, %c0_35] : memref<12x128xf32, #tpu.memory_space<vmem>>, vector<1x128xf32>
    %c7 = arith.constant 7 : index
    %c0_36 = arith.constant 0 : index
    %58 = vector.load %arg6[%c7, %c0_36] : memref<12x128xf32, #tpu.memory_space<vmem>>, vector<1x128xf32>
    %c8 = arith.constant 8 : index
    %c0_37 = arith.constant 0 : index
    %59 = vector.load %arg6[%c8, %c0_37] : memref<12x128xf32, #tpu.memory_space<vmem>>, vector<1x128xf32>
    %60 = arith.truncf %54 : vector<4x128xf32> to vector<4x128xbf16>
    %cst_38 = arith.constant dense<0.000000e+00> : vector<4x128xf32>
    %61 = tpu.matmul %60, %56, %cst_38 {dimension_numbers = #tpu.dot_dimension_numbers<[1], [0], [0], [1], [0, 0, 1, 1], [], []>} : vector<4x128xbf16>, vector<128x128xbf16>, vector<4x128xf32> -> vector<4x128xf32>
    %62 = vector.broadcast %57 : vector<1x128xf32> to vector<4x128xf32>
    %63 = arith.addf %61, %62 : vector<4x128xf32>
    %cst_39 = arith.constant dense<0.000000e+00> : vector<4x128xf32>
    %64 = tpu.matmul %63, %0, %cst_39 {dimension_numbers = #tpu.dot_dimension_numbers<[1], [0], [0], [1], [0, 0, 1, 1], [], []>} : vector<4x128xf32>, vector<128x128xf32>, vector<4x128xf32> -> vector<4x128xf32>
    %65 = arith.subf %63, %64 : vector<4x128xf32>
    %66 = arith.mulf %65, %65 : vector<4x128xf32>
    %cst_40 = arith.constant dense<0.000000e+00> : vector<4x128xf32>
    %67 = tpu.matmul %66, %0, %cst_40 {dimension_numbers = #tpu.dot_dimension_numbers<[1], [0], [0], [1], [0, 0, 1, 1], [], []>} : vector<4x128xf32>, vector<128x128xf32>, vector<4x128xf32> -> vector<4x128xf32>
    %cst_41 = arith.constant 9.99999974E-6 : f32
    %68 = vector.broadcast %cst_41 : f32 to vector<4x128xf32>
    %69 = arith.addf %67, %68 : vector<4x128xf32>
    %70 = math.rsqrt %69 : vector<4x128xf32>
    %71 = arith.mulf %65, %70 : vector<4x128xf32>
    %72 = vector.broadcast %58 : vector<1x128xf32> to vector<4x128xf32>
    %73 = arith.mulf %71, %72 : vector<4x128xf32>
    %74 = vector.broadcast %59 : vector<1x128xf32> to vector<4x128xf32>
    %75 = arith.addf %73, %74 : vector<4x128xf32>
    %cst_42 = arith.constant 0.000000e+00 : f32
    %76 = vector.broadcast %cst_42 : f32 to vector<4x128xf32>
    %77 = arith.maximumf %75, %76 : vector<4x128xf32>
    %c2_43 = arith.constant 2 : index
    %c0_44 = arith.constant 0 : index
    %c0_45 = arith.constant 0 : index
    %78 = vector.load %arg5[%c2_43, %c0_44, %c0_45] : memref<3x128x128xbf16, #tpu.memory_space<vmem>>, vector<1x128x128xbf16>
    %79 = vector.shape_cast %78 : vector<1x128x128xbf16> to vector<128x128xbf16>
    %c9 = arith.constant 9 : index
    %c0_46 = arith.constant 0 : index
    %80 = vector.load %arg6[%c9, %c0_46] : memref<12x128xf32, #tpu.memory_space<vmem>>, vector<1x128xf32>
    %c10 = arith.constant 10 : index
    %c0_47 = arith.constant 0 : index
    %81 = vector.load %arg6[%c10, %c0_47] : memref<12x128xf32, #tpu.memory_space<vmem>>, vector<1x128xf32>
    %c11 = arith.constant 11 : index
    %c0_48 = arith.constant 0 : index
    %82 = vector.load %arg6[%c11, %c0_48] : memref<12x128xf32, #tpu.memory_space<vmem>>, vector<1x128xf32>
    %83 = arith.truncf %77 : vector<4x128xf32> to vector<4x128xbf16>
    %cst_49 = arith.constant dense<0.000000e+00> : vector<4x128xf32>
    %84 = tpu.matmul %83, %79, %cst_49 {dimension_numbers = #tpu.dot_dimension_numbers<[1], [0], [0], [1], [0, 0, 1, 1], [], []>} : vector<4x128xbf16>, vector<128x128xbf16>, vector<4x128xf32> -> vector<4x128xf32>
    %85 = vector.broadcast %80 : vector<1x128xf32> to vector<4x128xf32>
    %86 = arith.addf %84, %85 : vector<4x128xf32>
    %cst_50 = arith.constant dense<0.000000e+00> : vector<4x128xf32>
    %87 = tpu.matmul %86, %0, %cst_50 {dimension_numbers = #tpu.dot_dimension_numbers<[1], [0], [0], [1], [0, 0, 1, 1], [], []>} : vector<4x128xf32>, vector<128x128xf32>, vector<4x128xf32> -> vector<4x128xf32>
    %88 = arith.subf %86, %87 : vector<4x128xf32>
    %89 = arith.mulf %88, %88 : vector<4x128xf32>
    %cst_51 = arith.constant dense<0.000000e+00> : vector<4x128xf32>
    %90 = tpu.matmul %89, %0, %cst_51 {dimension_numbers = #tpu.dot_dimension_numbers<[1], [0], [0], [1], [0, 0, 1, 1], [], []>} : vector<4x128xf32>, vector<128x128xf32>, vector<4x128xf32> -> vector<4x128xf32>
    %cst_52 = arith.constant 9.99999974E-6 : f32
    %91 = vector.broadcast %cst_52 : f32 to vector<4x128xf32>
    %92 = arith.addf %90, %91 : vector<4x128xf32>
    %93 = math.rsqrt %92 : vector<4x128xf32>
    %94 = arith.mulf %88, %93 : vector<4x128xf32>
    %95 = vector.broadcast %81 : vector<1x128xf32> to vector<4x128xf32>
    %96 = arith.mulf %94, %95 : vector<4x128xf32>
    %97 = vector.broadcast %82 : vector<1x128xf32> to vector<4x128xf32>
    %98 = arith.addf %96, %97 : vector<4x128xf32>
    %cst_53 = arith.constant 0.000000e+00 : f32
    %99 = vector.broadcast %cst_53 : f32 to vector<4x128xf32>
    %100 = arith.maximumf %98, %99 : vector<4x128xf32>
    %101 = arith.mulf %100, %4 : vector<4x128xf32>
    %102 = arith.mulf %1, %6 : vector<4x128xf32>
    %103 = arith.addf %101, %102 : vector<4x128xf32>
    %c0_54 = arith.constant 0 : index
    %c0_55 = arith.constant 0 : index
    %104 = vector.load %arg9[%c0_54, %c0_55] : memref<4x128xf32, #tpu.memory_space<vmem>>, vector<4x128xf32>
    tpu.vector_store %arg9[%c0_54, %c0_55], %103 {strides = array<i32>} : memref<4x128xf32, #tpu.memory_space<vmem>>, vector<4x128xf32>,
    return
  }
  func.func @transform_0(%arg0: i32) -> (i32, i32) {
    %c0_i32 = arith.constant 0 : i32
    %c0_i32_0 = arith.constant 0 : i32
    return %arg0, %c0_i32 : i32, i32
  }
  func.func @transform_1(%arg0: i32) -> (i32, i32) {
    %c0_i32 = arith.constant 0 : i32
    %c0_i32_0 = arith.constant 0 : i32
    return %arg0, %c0_i32 : i32, i32
  }
  func.func @transform_2(%arg0: i32) -> (i32, i32) {
    %c0_i32 = arith.constant 0 : i32
    %c0_i32_0 = arith.constant 0 : i32
    return %arg0, %c0_i32 : i32, i32
  }
  func.func @transform_3(%arg0: i32) -> (i32, i32) {
    %c0_i32 = arith.constant 0 : i32
    %c0_i32_0 = arith.constant 0 : i32
    %c0_i32_1 = arith.constant 0 : i32
    return %c0_i32, %c0_i32_0 : i32, i32
  }
  func.func @transform_4(%arg0: i32) -> (i32, i32, i32) {
    %c0_i32 = arith.constant 0 : i32
    %c0_i32_0 = arith.constant 0 : i32
    %c0_i32_1 = arith.constant 0 : i32
    %c0_i32_2 = arith.constant 0 : i32
    return %c0_i32, %c0_i32_0, %c0_i32_1 : i32, i32, i32
  }
  func.func @transform_5(%arg0: i32) -> (i32, i32) {
    %c0_i32 = arith.constant 0 : i32
    %c0_i32_0 = arith.constant 0 : i32
    %c0_i32_1 = arith.constant 0 : i32
    return %c0_i32, %c0_i32_0 : i32, i32
  }
  func.func @transform_6(%arg0: i32) -> (i32, i32) {
    %c0_i32 = arith.constant 0 : i32
    %c0_i32_0 = arith.constant 0 : i32
    %c0_i32_1 = arith.constant 0 : i32
    return %c0_i32, %c0_i32_0 : i32, i32
  }
  func.func @transform_7(%arg0: i32) -> (i32, i32) {
    %c0_i32 = arith.constant 0 : i32
    %c0_i32_0 = arith.constant 0 : i32
    %c0_i32_1 = arith.constant 0 : i32
    return %c0_i32, %c0_i32_0 : i32, i32
  }
  func.func @transform_8(%arg0: i32) -> (i32, i32) {
    %c0_i32 = arith.constant 0 : i32
    %c0_i32_0 = arith.constant 0 : i32
    return %arg0, %c0_i32 : i32, i32
  }
}

</mosaic_0001>

<bundles_post_ra>
// kernel: _lambda_.1
= control target key start
LH: loop header
LB: loop body
LE: loop exit
PB: predicated region body
PF: predicated region fallthrough
CT: control target
= control target key end

     0   :  { %vm116_vm0 = vcmask 523264   ;;  %vm53_vm1 = vcmask 1043456   ;;  %vm49_vm2 = vcmask 31744   ;;  %s1215_s3 = inlined_call_operand.vmem [shape: bf16[64,128], index: 3, kind: input, shape index: {}]   ;;  %s1216_s6 = inlined_call_operand.vmem [shape: f32[128,128], index: 6, kind: input, shape index: {}]   ;;  %s1217_s5 = inlined_call_operand.vmem [shape: f32[12,128], index: 5, kind: input, shape index: {}]   ;;  %s1218_s1 = inlined_call_operand.vmem [shape: f32[4,64], index: 1, kind: input, shape index: {}]   ;;  %s1219_s7 = inlined_call_operand.vmem [shape: f32[4,128], index: 7, kind: input, shape index: {}]   ;;  %s1220_s4 = inlined_call_operand.vmem [shape: bf16[3,128,128], index: 4, kind: input, shape index: {}]   ;;  %s1221_s2 = inlined_call_operand.vmem [shape: f32[4,4], index: 2, kind: input, shape index: {}]   ;;  %s1222_s0 = inlined_call_operand.vmem [shape: f32[4,128], index: 0, kind: input, shape index: {}]   ;;  %s1223_s8 = inlined_call_operand.vmem [shape: f32[4,128], index: 8, kind: output, shape index: {}]  }
   0x1   :  { %v773_v0 = vld [vmem:[%s1215_s3 + $0x18] sm:$0xff]  ;;  %v772_v2 = vld [vmem:[%s1215_s3 + $0x10] sm:$0xff]  ;;  %v883_v4 = vld [vmem:[%s1216_s6 + $0x68] sm:$0xff] }
   0x2   :  { %v869_v1 = vld [vmem:[%s1216_s6 + $0x78] sm:$0xff]  ;;  %124 = vmatpush.bf16.msra.mxu1 %v773_v0  ;;  %v878_v3 = vld [vmem:[%s1216_s6 + $0x70] sm:$0xff]  ;;  %v890_v5 = vld [vmem:[%s1216_s6 + $0x60] sm:$0xff] }
   0x3   :  { %133 = vmatpush.msra.mxu2 %v869_v1  ;;  %155 = vmatpush.msra.mxu3 %v869_v1  ;;  %v771_v6 = vld [vmem:[%s1215_s3 + $0x8] sm:$0xff]  ;;  %v900_v7 = vld [vmem:[%s1216_s6 + $0x58] sm:$0xff]  ;;  %v905_v8 = vld [vmem:[%s1216_s6 + $0x50] sm:$0xff] }
   0x4   :  { %v770_v9 = vld [vmem:[%s1215_s3] sm:$0xff]  ;;  %v920_v11 = vld [vmem:[%s1216_s6 + $0x48] sm:$0xff]  ;;  %v934_v14 = vld [vmem:[%s1216_s6 + $0x38] sm:$0xff] }
   0x5   :  { %134 = vmatpush.msra.mxu2 %v878_v3  ;;  %156 = vmatpush.msra.mxu3 %v878_v3  ;;  %v78_v10 = vld [vmem:[%s1218_s1] sm:$0xf]  ;;  %v942_v15 = vld [vmem:[%s1216_s6 + $0x30] sm:$0xff]  ;;  %v950_v16 = vld [vmem:[%s1216_s6 + $0x28] sm:$0xff] }
   0x6   :  { %125 = vmatpush.bf16.msra.mxu1 %v772_v2  ;;  %v90_v12 = vpack.c.bf16 %v78_v10, %v78_v10  ;;  %v927_v13 = vld [vmem:[%s1216_s6 + $0x40] sm:$0xff]  ;;  %v966_v18 = vld [vmem:[%s1216_s6 + $0x18] sm:$0xff]  ;;  %v974_v19 = vld [vmem:[%s1216_s6 + $0x10] sm:$0xff] }
   0x7   :  { %135 = vmatpush.msra.mxu2 %v883_v4  ;;  %157 = vmatpush.msra.mxu3 %v883_v4  ;;  %v958_v17 = vld [vmem:[%s1216_s6 + $0x20] sm:$0xff]  ;;  %v993_v20 = vld [vmem:[%s1216_s6 + $0x8] sm:$0xff]  ;;  %v781_v30 = vld [vmem:[%s1220_s4 + $0x38] sm:$0xff] }
   0x8   :  { %v1000_v21 = vld [vmem:[%s1216_s6] sm:$0xff]  ;;  %v780_v31 = vld [vmem:[%s1220_s4 + $0x30] sm:$0xff]  ;;  %v779_v32 = vld [vmem:[%s1220_s4 + $0x28] sm:$0xff] }
   0x9   :  { %136 = vmatpush.msra.mxu2 %v890_v5  ;;  %158 = vmatpush.msra.mxu3 %v890_v5  ;;  %v798_v22 = vld [vmem:[%s1217_s5] ss:$0 sm:$0xff]  ;;  %v777_v34 = vld [vmem:[%s1220_s4 + $0x18] sm:$0xff]  ;;  %v776_v35 = vld [vmem:[%s1220_s4 + $0x10] sm:$0xff] }
   0xa   :  { %126 = vmatpush.bf16.msra.mxu1 %v771_v6  ;;  %v48_v26 = vld [vmem:[%s1219_s7] sm:$0xf]  ;;  %v775_v37 = vld [vmem:[%s1220_s4 + $0x8] sm:$0xff]  ;;  %v789_v63 = vld [vmem:[%s1220_s4 + $0x78] sm:$0xff] }
   0xb   :  { %137 = vmatpush.msra.mxu2 %v900_v7  ;;  %159 = vmatpush.msra.mxu3 %v900_v7  ;;  %v778_v33 = vld [vmem:[%s1220_s4 + $0x20] sm:$0xff]  ;;  %v788_v0 = vld [vmem:[%s1220_s4 + $0x70] sm:$0xff]  ;;  %v787_v2 = vld [vmem:[%s1220_s4 + $0x68] sm:$0xff] }
   0xc   :  { %623 = vmatpush.msk.msra.mxu0 %vm53_vm1, %v48_v26  ;;  %v47_v36 = vld [vmem:[%s1221_s2] sm:$0xf]  ;;  %v784_v10 = vld [vmem:[%s1220_s4 + $0x50] sm:$0xff] }
   0xd   :  { %138 = vmatpush.msra.mxu2 %v905_v8  ;;  %160 = vmatpush.msra.mxu3 %v905_v8  ;;  %v774_v38 = vld [vmem:[%s1220_s4] sm:$0xff] }
   0xe   :  { %127 = vmatpush.bf16.msra.mxu1 %v770_v9  ;;  %260 = vmatpush.bf16.msrb.mxu0 %v781_v30  ;;  %v799_v47 = vld [vmem:[%s1217_s5 + $0x1] ss:$0 sm:$0xff]  ;;  %v800_v50 = vld [vmem:[%s1217_s5 + $0x2] ss:$0 sm:$0xff]  ;;  %v801_v56 = vld [vmem:[%s1217_s5 + $0x3] ss:$0 sm:$0xff] }
   0xf   :  { %139 = vmatpush.msra.mxu2 %v920_v11  ;;  %161 = vmatpush.msra.mxu3 %v920_v11  ;;  %v786_v6 = vld [vmem:[%s1220_s4 + $0x60] sm:$0xff]  ;;  %v785_v9 = vld [vmem:[%s1220_s4 + $0x58] sm:$0xff] }
  0x10   :  { %624 = vmatmul.msk.f32.vlgmr.msra.gmra.mxu0 %vm49_vm2, %v47_v36  ;;  %v794_v36 = vld [vmem:[%s1220_s4 + $0xa0] sm:$0xff] }
  0x11   :  { %140 = vmatpush.msra.mxu2 %v927_v13  ;;  %641 = vmatmul.msk.bf16.vlgmr.msra.gmra.mxu1 %vm116_vm0, %v90_v12  ;;  %v783_v12 = vld [vmem:[%s1220_s4 + $0x48] sm:$0xff] }
  0x12   :  { %273 = vmatpush.msrb.mxu1 %v869_v1  ;;  %162 = vmatpush.msra.mxu3 %v927_v13 }
  0x13   :  { %141 = vmatpush.msra.mxu2 %v934_v14  ;;  %261 = vmatpush.bf16.msrb.mxu0 %v780_v31 }
  0x14   :  { %274 = vmatpush.msrb.mxu1 %v878_v3  ;;  %163 = vmatpush.msra.mxu3 %v934_v14 }
  0x15   :  { %142 = vmatpush.msra.mxu2 %v942_v15 }
  0x16   :  { %275 = vmatpush.msrb.mxu1 %v883_v4  ;;  %164 = vmatpush.msra.mxu3 %v942_v15 }
  0x17   :  { %143 = vmatpush.msra.mxu2 %v950_v16  ;;  %262 = vmatpush.bf16.msrb.mxu0 %v779_v32 }
  0x18   :  { %276 = vmatpush.msrb.mxu1 %v890_v5  ;;  %165 = vmatpush.msra.mxu3 %v950_v16 }
  0x19   :  { %144 = vmatpush.msra.mxu2 %v958_v17 }
  0x1a   :  { %277 = vmatpush.msrb.mxu1 %v900_v7  ;;  %166 = vmatpush.msra.mxu3 %v958_v17 }
  0x1b   :  { %145 = vmatpush.msra.mxu2 %v966_v18  ;;  %263 = vmatpush.bf16.msrb.mxu0 %v778_v33 }
  0x1c   :  { %278 = vmatpush.msrb.mxu1 %v905_v8  ;;  %167 = vmatpush.msra.mxu3 %v966_v18 }
  0x1d   :  { %146 = vmatpush.msra.mxu2 %v974_v19 }
  0x1e   :  { %279 = vmatpush.msrb.mxu1 %v920_v11  ;;  %168 = vmatpush.msra.mxu3 %v974_v19 }
  0x1f   :  { %147 = vmatpush.msra.mxu2 %v993_v20  ;;  %264 = vmatpush.bf16.msrb.mxu0 %v777_v34  ;;  %v797_v34 = vld [vmem:[%s1220_s4 + $0xb8] sm:$0xff] }
  0x20   :  { %280 = vmatpush.msrb.mxu1 %v927_v13  ;;  %169 = vmatpush.msra.mxu3 %v993_v20 }
  0x21   :  { %148 = vmatpush.msra.mxu2 %v1000_v21 }
  0x22   :  { %281 = vmatpush.msrb.mxu1 %v934_v14  ;;  %170 = vmatpush.msra.mxu3 %v1000_v21 }
  0x23   :  { %295 = vmatpush.msrb.mxu2 %v869_v1  ;;  %265 = vmatpush.bf16.msrb.mxu0 %v776_v35  ;;  %v795_v35 = vld [vmem:[%s1220_s4 + $0xa8] sm:$0xff] }
  0x24   :  { %282 = vmatpush.msrb.mxu1 %v942_v15  ;;  %403 = vmatpush.bf16.msrb.mxu3 %v789_v63 }
  0x25   :  { %296 = vmatpush.msrb.mxu2 %v878_v3 }
  0x26   :  { %283 = vmatpush.msrb.mxu1 %v950_v16 }
  0x27   :  { %297 = vmatpush.msrb.mxu2 %v883_v4  ;;  %266 = vmatpush.bf16.msrb.mxu0 %v775_v37  ;;  %v793_v37 = vld [vmem:[%s1220_s4 + $0x98] sm:$0xff] }
  0x28   :  { %284 = vmatpush.msrb.mxu1 %v958_v17  ;;  %404 = vmatpush.bf16.msrb.mxu3 %v788_v0 }
  0x29   :  { %298 = vmatpush.msrb.mxu2 %v890_v5 }
  0x2a   :  { %285 = vmatpush.msrb.mxu1 %v966_v18 }
  0x2b   :  { %299 = vmatpush.msrb.mxu2 %v900_v7  ;;  %267 = vmatpush.bf16.msrb.mxu0 %v774_v38  ;;  %v792_v38 = vld [vmem:[%s1220_s4 + $0x90] sm:$0xff] }
  0x2c   :  { %286 = vmatpush.msrb.mxu1 %v974_v19  ;;  %405 = vmatpush.bf16.msrb.mxu3 %v787_v2 }
  0x2d   :  { %300 = vmatpush.msrb.mxu2 %v905_v8 }
  0x2e   :  { %287 = vmatpush.msrb.mxu1 %v993_v20 }
  0x2f   :  { %301 = vmatpush.msrb.mxu2 %v920_v11  ;;  %416 = vmatpush.msra.mxu0 %v869_v1 }
  0x30   :  { %288 = vmatpush.msrb.mxu1 %v1000_v21  ;;  %406 = vmatpush.bf16.msrb.mxu3 %v786_v6 }
  0x31   :  { %302 = vmatpush.msrb.mxu2 %v927_v13  ;;  %417 = vmatpush.msra.mxu0 %v878_v3 }
  0x32   :  { %438 = vmatpush.msra.mxu1 %v869_v1 }
  0x33   :  { %303 = vmatpush.msrb.mxu2 %v934_v14  ;;  %418 = vmatpush.msra.mxu0 %v883_v4 }
  0x34   :  { %439 = vmatpush.msra.mxu1 %v878_v3  ;;  %407 = vmatpush.bf16.msrb.mxu3 %v785_v9 }
  0x35   :  { %304 = vmatpush.msrb.mxu2 %v942_v15  ;;  %419 = vmatpush.msra.mxu0 %v890_v5 }
  0x36   :  { %440 = vmatpush.msra.mxu1 %v883_v4 }
  0x37   :  { %305 = vmatpush.msrb.mxu2 %v950_v16  ;;  %420 = vmatpush.msra.mxu0 %v900_v7 }
  0x38   :  { %441 = vmatpush.msra.mxu1 %v890_v5  ;;  %408 = vmatpush.bf16.msrb.mxu3 %v784_v10 }
  0x39   :  { %306 = vmatpush.msrb.mxu2 %v958_v17  ;;  %421 = vmatpush.msra.mxu0 %v905_v8 }
  0x3a   :  { %442 = vmatpush.msra.mxu1 %v900_v7 }
  0x3b   :  { %307 = vmatpush.msrb.mxu2 %v966_v18  ;;  %422 = vmatpush.msra.mxu0 %v920_v11 }
  0x3c   :  { %443 = vmatpush.msra.mxu1 %v905_v8  ;;  %409 = vmatpush.bf16.msrb.mxu3 %v783_v12 }
  0x3d   :  { %308 = vmatpush.msrb.mxu2 %v974_v19  ;;  %423 = vmatpush.msra.mxu0 %v927_v13 }
  0x3e   :  { %444 = vmatpush.msra.mxu1 %v920_v11 }
  0x3f   :  { %309 = vmatpush.msrb.mxu2 %v993_v20  ;;  %424 = vmatpush.msra.mxu0 %v934_v14 }
  0x40   :  { %445 = vmatpush.msra.mxu1 %v927_v13 }
  0x41   :  { %310 = vmatpush.msrb.mxu2 %v1000_v21  ;;  %425 = vmatpush.msra.mxu0 %v942_v15 }
  0x42   :  { %446 = vmatpush.msra.mxu1 %v934_v14 }
  0x43   :  { %426 = vmatpush.msra.mxu0 %v950_v16 }
  0x44   :  { %447 = vmatpush.msra.mxu1 %v942_v15 }
  0x45   :  { %427 = vmatpush.msra.mxu0 %v958_v17 }
  0x46   :  { %448 = vmatpush.msra.mxu1 %v950_v16 }
  0x47   :  { %428 = vmatpush.msra.mxu0 %v966_v18 }
  0x48   :  { %449 = vmatpush.msra.mxu1 %v958_v17 }
  0x49   :  { %429 = vmatpush.msra.mxu0 %v974_v19 }
  0x4a   :  { %450 = vmatpush.msra.mxu1 %v966_v18 }
  0x4b   :  { %430 = vmatpush.msra.mxu0 %v993_v20 }
  0x4c   :  { %451 = vmatpush.msra.mxu1 %v974_v19 }
  0x4d   :  { %431 = vmatpush.msra.mxu0 %v1000_v21 }
  0x4e   :  { %452 = vmatpush.msra.mxu1 %v993_v20 }
  0x50   :  { %453 = vmatpush.msra.mxu1 %v1000_v21 }
  0x8d   :  { %v1109_v55 = vpop.f32.mrf.mxu0 }
  0x8e   :  { %v129_v23 = vpop.f32.mrf.mxu1 }
  0x8f   :  { %v130_v24 = vadd.f32 %v798_v22, %v129_v23  ;;  %v782_v22 = vld [vmem:[%s1220_s4 + $0x40] sm:$0xff] }
  0x90   :  { %410 = vmatpush.bf16.msrb.mxu3 %v782_v22 }
  0x91   :  { %149 = vmatmul.f32.vlgmr.msra.gmra.mxu2 %v130_v24 }
  0x92   :  { %544 = vmatpush.bf16.msra.mxu2 %v797_v34 }
  0x96   :  { %v131_v25 = vpop.f32.mrf.mxu1 }
 0x114   :  { %v150_v27 = vpop.f32.mrf.mxu2 }
 0x115   :  { %v153_v28 = vsub.f32 %v130_v24, %v150_v27 }
 0x117   :  { %v154_v29 = vmul.f32 %v153_v28, %v153_v28 }
 0x119   :  { %171 = vmatmul.f32.vlgmr.msra.gmra.mxu3 %v154_v29 }
 0x11a   :  { %557 = vmatpush.msra.mxu3 %v869_v1 }
 0x11c   :  { %558 = vmatpush.msra.mxu3 %v878_v3 }
 0x11e   :  { %559 = vmatpush.msra.mxu3 %v883_v4 }
 0x120   :  { %560 = vmatpush.msra.mxu3 %v890_v5 }
 0x122   :  { %561 = vmatpush.msra.mxu3 %v900_v7 }
 0x124   :  { %562 = vmatpush.msra.mxu3 %v905_v8 }
 0x126   :  { %563 = vmatpush.msra.mxu3 %v920_v11 }
 0x128   :  { %564 = vmatpush.msra.mxu3 %v927_v13 }
 0x12a   :  { %565 = vmatpush.msra.mxu3 %v934_v14 }
 0x12c   :  { %566 = vmatpush.msra.mxu3 %v942_v15 }
 0x12e   :  { %567 = vmatpush.msra.mxu3 %v950_v16 }
 0x130   :  { %568 = vmatpush.msra.mxu3 %v958_v17 }
 0x132   :  { %569 = vmatpush.msra.mxu3 %v966_v18 }
 0x134   :  { %570 = vmatpush.msra.mxu3 %v974_v19 }
 0x136   :  { %571 = vmatpush.msra.mxu3 %v993_v20 }
 0x138   :  { %572 = vmatpush.msra.mxu3 %v1000_v21 }
 0x19c   :  { %v172_v39 = vpop.f32.mrf.mxu3 }
 0x19d   :  { %v173_v40 = vadd.f32 1e-05, %v172_v39  ;;  %v791_v39 = vld [vmem:[%s1220_s4 + $0x88] sm:$0xff] }
 0x19f   :  { %810 = vrsqrt.f32 %v173_v40  ;;  %vm181_vm4 = vweird.f32 %v173_v40 }
 0x1a5   :  { %v811_v41 = vpop.eup %810 }
 0x1a6   :  { %v176_v42 = vmul.f32 %v811_v41, %v173_v40  ;;  %vm182_vm3 = vweird.f32 %v811_v41  ;;  %v790_v40 = vld [vmem:[%s1220_s4 + $0x80] sm:$0xff] }
 0x1a7   :  { %vm183_vm5 = vmor %vm181_vm4, %vm182_vm3 }
 0x1a8   :  { %v177_v43 = vmul.f32 %v811_v41, %v176_v42 }
 0x1aa   :  { %v178_v44 = vmul.f32 0.5, %v177_v43 }
 0x1ac   :  { %v179_v45 = vsub.f32 1.5, %v178_v44 }
 0x1ae   :  { %v180_v46 = vmul.f32 %v811_v41, %v179_v45 }
 0x1b0   :  { %v184_v48 = vsel %vm183_vm5, %v811_v41, %v180_v46 }
 0x1b1   :  { %v185_v49 = vmul.f32 %v184_v48, %v153_v28 }
 0x1b3   :  { %v187_v51 = vmul.f32 %v799_v47, %v185_v49  ;;  %v805_v49 = vld [vmem:[%s1217_s5 + $0x7] ss:$0 sm:$0xff] }
 0x1b5   :  { %v189_v52 = vadd.f32 %v800_v50, %v187_v51 }
 0x1b7   :  { %v190_v53 = vmax.f32 %v189_v52, 0.0  ;;  %v806_v52 = vld [vmem:[%s1217_s5 + $0x8] ss:$0 sm:$0xff] }
 0x1b9   :  { %v210_v54 = vpack.c.bf16 %v190_v53, %v190_v53 }
 0x1bb   :  { %268 = vmatmul.bf16.vlgmr.msrb.gmra.mxu0 %v210_v54 }
 0x1bc   :  { %579 = vmatpush.msrb.mxu0 %v869_v1 }
 0x1be   :  { %580 = vmatpush.msrb.mxu0 %v878_v3 }
 0x1c0   :  { %581 = vmatpush.msrb.mxu0 %v883_v4  ;;  %v802_v4 = vld [vmem:[%s1217_s5 + $0x4] ss:$0 sm:$0xff] }
 0x1c2   :  { %582 = vmatpush.msrb.mxu0 %v890_v5 }
 0x1c4   :  { %583 = vmatpush.msrb.mxu0 %v900_v7 }
 0x1c6   :  { %584 = vmatpush.msrb.mxu0 %v905_v8  ;;  %v803_v8 = vld [vmem:[%s1217_s5 + $0x5] ss:$0 sm:$0xff] }
 0x1c8   :  { %585 = vmatpush.msrb.mxu0 %v920_v11 }
 0x1ca   :  { %586 = vmatpush.msrb.mxu0 %v927_v13 }
 0x1cc   :  { %587 = vmatpush.msrb.mxu0 %v934_v14 }
 0x1ce   :  { %588 = vmatpush.msrb.mxu0 %v942_v15  ;;  %v1163_v15 = vld [vmem:[%s1222_s0] sm:$0xf] }
 0x1d0   :  { %589 = vmatpush.msrb.mxu0 %v950_v16 }
 0x1d2   :  { %590 = vmatpush.msrb.mxu0 %v958_v17 }
 0x1d4   :  { %591 = vmatpush.msrb.mxu0 %v966_v18  ;;  %v804_v18 = vld [vmem:[%s1217_s5 + $0x6] ss:$0 sm:$0xff] }
 0x1d6   :  { %592 = vmatpush.msrb.mxu0 %v974_v19 }
 0x1d8   :  { %593 = vmatpush.msrb.mxu0 %v993_v20 }
 0x1da   :  { %594 = vmatpush.msrb.mxu0 %v1000_v21  ;;  %v796_v21 = vld [vmem:[%s1220_s4 + $0xb0] sm:$0xff] }
 0x1db   :  { %545 = vmatpush.bf16.msra.mxu2 %v796_v21 }
 0x1df   :  { %546 = vmatpush.bf16.msra.mxu2 %v795_v35 }
 0x1e3   :  { %547 = vmatpush.bf16.msra.mxu2 %v794_v36 }
 0x1e7   :  { %548 = vmatpush.bf16.msra.mxu2 %v793_v37 }
 0x1eb   :  { %549 = vmatpush.bf16.msra.mxu2 %v792_v38 }
 0x1ef   :  { %550 = vmatpush.bf16.msra.mxu2 %v791_v39 }
 0x1f3   :  { %551 = vmatpush.bf16.msra.mxu2 %v790_v40 }
 0x238   :  { %v269_v57 = vpop.f32.mrf.mxu0 }
 0x239   :  { %v270_v58 = vadd.f32 %v801_v56, %v269_v57 }
 0x23b   :  { %289 = vmatmul.f32.vlgmr.msrb.gmra.mxu1 %v270_v58 }
 0x240   :  { %v271_v59 = vpop.f32.mrf.mxu0 }
 0x2b8   :  { %v290_v60 = vpop.f32.mrf.mxu1 }
 0x2b9   :  { %v293_v61 = vsub.f32 %v270_v58, %v290_v60  ;;  %v807_v58 = vld [vmem:[%s1217_s5 + $0x9] ss:$0 sm:$0xff] }
 0x2bb   :  { %v294_v62 = vmul.f32 %v293_v61, %v293_v61 }
 0x2bd   :  { %311 = vmatmul.f32.vlgmr.msrb.gmra.mxu2 %v294_v62 }
 0x340   :  { %v312_v23 = vpop.f32.mrf.mxu2 }
 0x341   :  { %v313_v24 = vadd.f32 1e-05, %v312_v23 }
 0x343   :  { %812 = vrsqrt.f32 %v313_v24  ;;  %vm321_vm7 = vweird.f32 %v313_v24 }
 0x349   :  { %v813_v25 = vpop.eup %812 }
 0x34a   :  { %v316_v26 = vmul.f32 %v813_v25, %v313_v24  ;;  %vm322_vm6 = vweird.f32 %v813_v25 }
 0x34b   :  { %vm323_vm8 = vmor %vm321_vm7, %vm322_vm6 }
 0x34c   :  { %v317_v27 = vmul.f32 %v813_v25, %v316_v26 }
 0x34e   :  { %v318_v28 = vmul.f32 0.5, %v317_v27 }
 0x350   :  { %v319_v1 = vsub.f32 1.5, %v318_v28  ;;  %v809_v28 = vld [vmem:[%s1217_s5 + $0xb] ss:$0 sm:$0xff] }
 0x352   :  { %v320_v3 = vmul.f32 %v813_v25, %v319_v1 }
 0x354   :  { %v324_v5 = vsel %vm323_vm8, %v813_v25, %v320_v3  ;;  %v808_v25 = vld [vmem:[%s1217_s5 + $0xa] ss:$0 sm:$0xff]  ;;  %v77_v3 = vsub.f32 1.0, %v1109_v55 }
 0x355   :  { %v325_v7 = vmul.f32 %v324_v5, %v293_v61 }
 0x357   :  { %v327_v11 = vmul.f32 %v802_v4, %v325_v7  ;;  %v616_v7 = vmul.f32 %v77_v3, %v1163_v15 }
 0x359   :  { %v329_v13 = vadd.f32 %v803_v8, %v327_v11 }
 0x35b   :  { %v330_v14 = vmax.f32 %v329_v13, 0.0 }
 0x35d   :  { %v331_v29 = vmul.f32 %v330_v14, %v1109_v55 }
 0x35f   :  { %v332_v16 = vadd.f32 %v331_v29, %v1163_v15 }
 0x361   :  { %v353_v17 = vpack.c.bf16 %v332_v16, %v332_v16 }
 0x363   :  { %411 = vmatmul.bf16.vlgmr.msrb.gmra.mxu3 %v353_v17 }
 0x3e6   :  { %v412_v19 = vpop.f32.mrf.mxu3 }
 0x3e7   :  { %v413_v30 = vadd.f32 %v804_v18, %v412_v19 }
 0x3e9   :  { %432 = vmatmul.f32.vlgmr.msra.gmra.mxu0 %v413_v30 }
 0x3ee   :  { %v414_v31 = vpop.f32.mrf.mxu3 }
 0x466   :  { %v433_v20 = vpop.f32.mrf.mxu0 }
 0x467   :  { %v436_v32 = vsub.f32 %v413_v30, %v433_v20 }
 0x469   :  { %v437_v33 = vmul.f32 %v436_v32, %v436_v32 }
 0x46b   :  { %454 = vmatmul.f32.vlgmr.msra.gmra.mxu1 %v437_v33 }
 0x4e8   :  { %v455_v41 = vpop.f32.mrf.mxu1 }
 0x4e9   :  { %v456_v42 = vadd.f32 1e-05, %v455_v41 }
 0x4eb   :  { %814 = vrsqrt.f32 %v456_v42  ;;  %vm464_vm10 = vweird.f32 %v456_v42 }
 0x4f1   :  { %v815_v43 = vpop.eup %814 }
 0x4f2   :  { %v459_v44 = vmul.f32 %v815_v43, %v456_v42  ;;  %vm465_vm9 = vweird.f32 %v815_v43 }
 0x4f3   :  { %vm466_vm11 = vmor %vm464_vm10, %vm465_vm9 }
 0x4f4   :  { %v460_v45 = vmul.f32 %v815_v43, %v459_v44 }
 0x4f6   :  { %v461_v46 = vmul.f32 0.5, %v460_v45 }
 0x4f8   :  { %v462_v47 = vsub.f32 1.5, %v461_v46 }
 0x4fa   :  { %v463_v48 = vmul.f32 %v815_v43, %v462_v47 }
 0x4fc   :  { %v467_v50 = vsel %vm466_vm11, %v815_v43, %v463_v48 }
 0x4fd   :  { %v468_v51 = vmul.f32 %v467_v50, %v436_v32 }
 0x4ff   :  { %v470_v53 = vmul.f32 %v805_v49, %v468_v51 }
 0x501   :  { %v472_v54 = vadd.f32 %v806_v52, %v470_v53 }
 0x503   :  { %v473_v56 = vmax.f32 %v472_v54, 0.0 }
 0x505   :  { %v494_v57 = vpack.c.bf16 %v473_v56, %v473_v56 }
 0x507   :  { %552 = vmatmul.bf16.vlgmr.msra.gmra.mxu2 %v494_v57 }
 0x58a   :  { %v553_v59 = vpop.f32.mrf.mxu2 }
 0x58b   :  { %v554_v60 = vadd.f32 %v807_v58, %v553_v59 }
 0x58d   :  { %573 = vmatmul.f32.vlgmr.msra.gmra.mxu3 %v554_v60 }
 0x592   :  { %v555_v61 = vpop.f32.mrf.mxu2 }
 0x610   :  { %v574_v62 = vpop.f32.mrf.mxu3 }
 0x611   :  { %v577_v63 = vsub.f32 %v554_v60, %v574_v62 }
 0x613   :  { %v578_v0 = vmul.f32 %v577_v63, %v577_v63 }
 0x615   :  { %595 = vmatmul.f32.vlgmr.msrb.gmra.mxu0 %v578_v0 }
 0x692   :  { %v596_v2 = vpop.f32.mrf.mxu0 }
 0x693   :  { %v597_v6 = vadd.f32 1e-05, %v596_v2 }
 0x695   :  { %816 = vrsqrt.f32 %v597_v6  ;;  %vm605_vm13 = vweird.f32 %v597_v6 }
 0x69b   :  { %v817_v9 = vpop.eup %816 }
 0x69c   :  { %v600_v10 = vmul.f32 %v817_v9, %v597_v6  ;;  %vm606_vm12 = vweird.f32 %v817_v9 }
 0x69d   :  { %vm607_vm14 = vmor %vm605_vm13, %vm606_vm12 }
 0x69e   :  { %v601_v12 = vmul.f32 %v817_v9, %v600_v10 }
 0x6a0   :  { %v602_v22 = vmul.f32 0.5, %v601_v12 }
 0x6a2   :  { %v603_v23 = vsub.f32 1.5, %v602_v22 }
 0x6a4   :  { %v604_v24 = vmul.f32 %v817_v9, %v603_v23 }
 0x6a6   :  { %v608_v26 = vsel %vm607_vm14, %v817_v9, %v604_v24 }
 0x6a7   :  { %v609_v27 = vmul.f32 %v608_v26, %v577_v63 }
 0x6a9   :  { %v611_v1 = vmul.f32 %v808_v25, %v609_v27 }
 0x6ab   :  { %v613_v4 = vadd.f32 %v809_v28, %v611_v1 }
 0x6ad   :  { %v614_v5 = vmax.f32 %v613_v4, 0.0 }
 0x6af   :  { %v615_v8 = vmul.f32 %v614_v5, %v1109_v55 }
 0x6b1   :  { %v617_v11 = vadd.f32 %v616_v7, %v615_v8 }
 0x6b3   :  { %618 = vst [vmem:[%s1223_s8] sm:$0xf] %v617_v11 }

</bundles_post_ra>
